<compile_context>
chip_gen: v7x
topology: tpu7x:2x2x1
jax: 0.10.0
libtpu: 0.0.40
codegen_flags: <defaults>
</compile_context>

<pallas_src>
import jax
import jax.numpy as jnp
from jax import lax
from jax.experimental import pallas as pl
from jax.experimental.pallas import tpu as pltpu

_LANE = 128


def solu_mlp_kernel(x_ref, w1_ref, b1_ref, g_ref, beta_ref, w2_ref, b2_ref,
                    o_ref):
    # fc1: feed operands in native dtype, accumulate in f32 on the MXU.
    h = jnp.dot(x_ref[...], w1_ref[...], preferred_element_type=jnp.float32)
    h = h + b1_ref[...].astype(jnp.float32)

    # SoLU: h * softmax(h, axis=-1)  (temperature = 1.0)
    m = jnp.max(h, axis=-1, keepdims=True)
    e = jnp.exp(h - m)
    denom = jnp.sum(e, axis=-1, keepdims=True)
    # approx reciprocal -> EUP vrcp slot; per-row scale error cancels in LN.
    h = h * (e * pl.reciprocal(denom, approx=True))

    # LayerNorm over last dim (eps = 1e-5), fused statistics:
    #   mu = sum(h)/H ; var = sum(h*h)/H - mu^2
    inv_h = 1.0 / h.shape[-1]
    s1 = jnp.sum(h, axis=-1, keepdims=True)
    s2 = jnp.sum(h * h, axis=-1, keepdims=True)
    mu = s1 * inv_h
    var = s2 * inv_h - mu * mu
    hn = (h - mu) * lax.rsqrt(var + 1e-5)
    hn = hn * g_ref[...].astype(jnp.float32) + beta_ref[...].astype(jnp.float32)

    # fc2: cast back to the weight dtype so bf16 weights get bf16 LHS.
    y = jnp.dot(hn.astype(w2_ref.dtype), w2_ref[...],
                preferred_element_type=jnp.float32)
    y = y + b2_ref[...].astype(jnp.float32)

    o_ref[...] = y.astype(o_ref.dtype)


def _pick_block_rows(B):
    """Largest MXU-friendly row tile; prefer >=2 grid steps (v7x megacore)."""
    candidates = (512, 256, 128, 64, 32, 16, 8)
    for c in candidates:
        if B % c == 0 and B // c >= 2:
            return c
    for c in candidates:
        if B % c == 0:
            return c
    return B  # odd small batch: single full-extent tile


def _vmem_limit_bytes(block_rows, d_in, hid, d_out_p, in_bytes, out_bytes):
    budget = 0
    budget += 2 * block_rows * d_in * in_bytes          # x tile (double-buffered)
    budget += 2 * block_rows * d_out_p * out_bytes      # out tile (double-buffered)
    budget += 2 * d_in * hid * in_bytes                 # W1 (allow 2 copies)
    budget += 2 * hid * d_out_p * in_bytes              # W2 (allow 2 copies)
    budget += 4 * 2 * (3 * hid + d_out_p) * 4           # biases / gamma / beta
    budget += 6 * block_rows * hid * 4                  # f32 intermediates
    budget += 2 * block_rows * d_out_p * 4
    budget = int(budget * 1.5) + (1 << 20)              # margin
    try:
        cap = int(pltpu.get_tpu_info().vmem_capacity_bytes)
    except Exception:
        cap = 64 * 1024 * 1024                          # conservative (v7x per-TC)
    return min(max(budget, 16 * 1024 * 1024), int(cap * 0.9))


def solu_mlp(x, w1, b1, gamma, beta, w2, b2, *, block_rows=None):
    """x: [B, D_in]; w1: [D_in, H]; b1/gamma/beta: [H];
       w2: [H, D_out]; b2: [D_out]  ->  [B, D_out]"""
    B, D_in = x.shape
    H = w1.shape[1]
    D_out = w2.shape[1]

    if block_rows is None:
        block_rows = _pick_block_rows(B)
    assert B % block_rows == 0, "batch must be divisible by block_rows"

    # Pad D_out to a lane-dense multiple of 128 (zero weight/bias columns,
    # sliced off after the call). Padding is semantically a no-op.
    D_out_p = D_out if D_out % _LANE == 0 else ((D_out + _LANE - 1) // _LANE) * _LANE
    if D_out_p != D_out:
        w2 = jnp.pad(w2, ((0, 0), (0, D_out_p - D_out)))
        b2 = jnp.pad(b2, (0, D_out_p - D_out))

    b1_2d = b1.reshape(1, H)
    g_2d = gamma.reshape(1, H)
    beta_2d = beta.reshape(1, H)
    b2_2d = b2.reshape(1, D_out_p)

    vmem_limit = _vmem_limit_bytes(
        block_rows, D_in, H, D_out_p, x.dtype.itemsize, x.dtype.itemsize)

    grid = (B // block_rows,)

    out = pl.pallas_call(
        solu_mlp_kernel,
        out_shape=jax.ShapeDtypeStruct((B, D_out_p), x.dtype),
        grid_spec=pltpu.PrefetchScalarGridSpec(
            num_scalar_prefetch=0,
            grid=grid,
            in_specs=[
                pl.BlockSpec((block_rows, D_in), lambda i: (i, 0)),  # x tile
                # Weights / vectors: constant index_map -> resident across grid.
                pl.BlockSpec((D_in, H), lambda i: (0, 0)),           # W1 (full)
                pl.BlockSpec((1, H), lambda i: (0, 0)),              # b1
                pl.BlockSpec((1, H), lambda i: (0, 0)),              # gamma
                pl.BlockSpec((1, H), lambda i: (0, 0)),              # beta
                pl.BlockSpec((H, D_out_p), lambda i: (0, 0)),        # W2 (full)
                pl.BlockSpec((1, D_out_p), lambda i: (0, 0)),        # b2
            ],
            out_specs=pl.BlockSpec((block_rows, D_out_p), lambda i: (i, 0)),
        ),
        compiler_params=pltpu.CompilerParams(
            dimension_semantics=("parallel",),
            vmem_limit_bytes=vmem_limit),
    )(x, w1, b1_2d, g_2d, beta_2d, w2, b2_2d)

    if D_out_p != D_out:
        out = out[:, :D_out]
    return out


def solu_mlp_reference(x, w1, b1, gamma, beta, w2, b2):
    h = x @ w1 + b1
    h = h * jax.nn.softmax(h, axis=-1)
    mu = jnp.mean(h, axis=-1, keepdims=True)
    var = jnp.mean((h - mu) ** 2, axis=-1, keepdims=True)
    hn = (h - mu) / jnp.sqrt(var + 1e-5)
    hn = hn * gamma + beta
    return hn @ w2 + b2


if __name__ == "__main__":
    # Small shapes consistent with the module: batch=8, input=32, hidden=64, output=16
    B, D_IN, HID, D_OUT = 8, 32, 64, 16

    key = jax.random.PRNGKey(0)
    kx, kw1, kb1, kw2, kb2 = jax.random.split(key, 5)

    x = jax.random.normal(kx, (B, D_IN), dtype=jnp.float32)

    # Deterministic parameter init (PyTorch Linear-style uniform bounds),
    # stored in transposed layout for the kernel.
    bound1 = 1.0 / jnp.sqrt(D_IN)
    w1 = jax.random.uniform(kw1, (D_IN, HID), jnp.float32, -bound1, bound1)
    b1 = jax.random.uniform(kb1, (HID,), jnp.float32, -bound1, bound1)

    bound2 = 1.0 / jnp.sqrt(HID)
    w2 = jax.random.uniform(kw2, (HID, D_OUT), jnp.float32, -bound2, bound2)
    b2 = jax.random.uniform(kb2, (D_OUT,), jnp.float32, -bound2, bound2)

    gamma = jnp.ones((HID,), jnp.float32)   # nn.LayerNorm default weight
    beta = jnp.zeros((HID,), jnp.float32)   # nn.LayerNorm default bias

    out = solu_mlp(x, w1, b1, gamma, beta, w2, b2)
    out = jax.block_until_ready(out)

    ref = solu_mlp_reference(x, w1, b1, gamma, beta, w2, b2)
    assert out.shape == (B, D_OUT)
    # approx reciprocal in the softmax denom shifts results slightly; keep a
    # 1e-3-level tolerance.
    assert jnp.allclose(out, ref, atol=1e-3, rtol=1e-3), (
        float(jnp.max(jnp.abs(out - ref))))

    print("KERNEL_OK")
</pallas_src>

<mosaic_0001>
module attributes {stable_mosaic.version = 11 : i64} {
  func.func @solu_mlp_kernel(%arg0: i32, %arg1: memref<8x32xf32, #tpu.memory_space<vmem>>, %arg2: memref<32x64xf32, #tpu.memory_space<vmem>>, %arg3: memref<1x64xf32, #tpu.memory_space<vmem>>, %arg4: memref<1x64xf32, #tpu.memory_space<vmem>>, %arg5: memref<1x64xf32, #tpu.memory_space<vmem>>, %arg6: memref<64x128xf32, #tpu.memory_space<vmem>>, %arg7: memref<1x128xf32, #tpu.memory_space<vmem>>, %arg8: memref<8x128xf32, #tpu.memory_space<vmem>>) attributes {dimension_semantics = [#tpu.dimension_semantics<parallel>], iteration_bounds = array<i64: 1>, scalar_prefetch = 0 : i64, scratch_operands = 0 : i64, tpu.core_type = #tpu.core_type<tc>, window_params = [{transform_indices = @transform_0, window_bounds = array<i64: 8, 32>}, {pipeline_mode = #tpu.pipeline_mode<synchronous>, transform_indices = @transform_1, window_bounds = array<i64: 32, 64>}, {pipeline_mode = #tpu.pipeline_mode<synchronous>, transform_indices = @transform_2, window_bounds = array<i64: 1, 64>}, {pipeline_mode = #tpu.pipeline_mode<synchronous>, transform_indices = @transform_3, window_bounds = array<i64: 1, 64>}, {pipeline_mode = #tpu.pipeline_mode<synchronous>, transform_indices = @transform_4, window_bounds = array<i64: 1, 64>}, {pipeline_mode = #tpu.pipeline_mode<synchronous>, transform_indices = @transform_5, window_bounds = array<i64: 64, 128>}, {pipeline_mode = #tpu.pipeline_mode<synchronous>, transform_indices = @transform_6, window_bounds = array<i64: 1, 128>}, {transform_indices = @transform_7, window_bounds = array<i64: 8, 128>}]} {
    %c0 = arith.constant 0 : index
    %c0_0 = arith.constant 0 : index
    %0 = vector.load %arg1[%c0, %c0_0] : memref<8x32xf32, #tpu.memory_space<vmem>>, vector<8x32xf32>
    %c0_1 = arith.constant 0 : index
    %c0_2 = arith.constant 0 : index
    %1 = vector.load %arg2[%c0_1, %c0_2] : memref<32x64xf32, #tpu.memory_space<vmem>>, vector<32x64xf32>
    %cst = arith.constant dense<0.000000e+00> : vector<8x64xf32>
    %2 = tpu.matmul %0, %1, %cst {dimension_numbers = #tpu.dot_dimension_numbers<[1], [0], [0], [1], [0, 0, 1, 1], [], []>} : vector<8x32xf32>, vector<32x64xf32>, vector<8x64xf32> -> vector<8x64xf32>
    %c0_3 = arith.constant 0 : index
    %c0_4 = arith.constant 0 : index
    %3 = vector.load %arg3[%c0_3, %c0_4] : memref<1x64xf32, #tpu.memory_space<vmem>>, vector<1x64xf32>
    %4 = vector.broadcast %3 : vector<1x64xf32> to vector<8x64xf32>
    %5 = arith.addf %2, %4 : vector<8x64xf32>
    %cst_5 = arith.constant dense<0xFF800000> : vector<8xf32>
    %6 = vector.multi_reduction <maximumf>, %5, %cst_5 [1] : vector<8x64xf32> to vector<8xf32>
    %7 = vector.shape_cast %6 : vector<8xf32> to vector<8x1xf32>
    %8 = vector.broadcast %7 : vector<8x1xf32> to vector<8x64xf32>
    %9 = arith.subf %5, %8 : vector<8x64xf32>
    %10 = math.exp %9 : vector<8x64xf32>
    %cst_6 = arith.constant dense<0.000000e+00> : vector<8xf32>
    %11 = vector.multi_reduction <add>, %10, %cst_6 [1] : vector<8x64xf32> to vector<8xf32>
    %12 = vector.shape_cast %11 : vector<8xf32> to vector<8x1xf32>
    %13 = tpu.reciprocal %12 {approx = true} : vector<8x1xf32> -> vector<8x1xf32>
    %14 = vector.broadcast %13 : vector<8x1xf32> to vector<8x64xf32>
    %15 = arith.mulf %10, %14 : vector<8x64xf32>
    %16 = arith.mulf %5, %15 : vector<8x64xf32>
    %cst_7 = arith.constant dense<0.000000e+00> : vector<8xf32>
    %17 = vector.multi_reduction <add>, %16, %cst_7 [1] : vector<8x64xf32> to vector<8xf32>
    %18 = vector.shape_cast %17 : vector<8xf32> to vector<8x1xf32>
    %19 = arith.mulf %16, %16 : vector<8x64xf32>
    %cst_8 = arith.constant dense<0.000000e+00> : vector<8xf32>
    %20 = vector.multi_reduction <add>, %19, %cst_8 [1] : vector<8x64xf32> to vector<8xf32>
    %21 = vector.shape_cast %20 : vector<8xf32> to vector<8x1xf32>
    %cst_9 = arith.constant 1.562500e-02 : f32
    %22 = vector.broadcast %cst_9 : f32 to vector<8x1xf32>
    %23 = arith.mulf %18, %22 : vector<8x1xf32>
    %cst_10 = arith.constant 1.562500e-02 : f32
    %24 = vector.broadcast %cst_10 : f32 to vector<8x1xf32>
    %25 = arith.mulf %21, %24 : vector<8x1xf32>
    %26 = arith.mulf %23, %23 : vector<8x1xf32>
    %27 = arith.subf %25, %26 : vector<8x1xf32>
    %28 = vector.broadcast %23 : vector<8x1xf32> to vector<8x64xf32>
    %29 = arith.subf %16, %28 : vector<8x64xf32>
    %cst_11 = arith.constant 9.99999974E-6 : f32
    %30 = vector.broadcast %cst_11 : f32 to vector<8x1xf32>
    %31 = arith.addf %27, %30 : vector<8x1xf32>
    %32 = math.rsqrt %31 : vector<8x1xf32>
    %33 = vector.broadcast %32 : vector<8x1xf32> to vector<8x64xf32>
    %34 = arith.mulf %29, %33 : vector<8x64xf32>
    %c0_12 = arith.constant 0 : index
    %c0_13 = arith.constant 0 : index
    %35 = vector.load %arg4[%c0_12, %c0_13] : memref<1x64xf32, #tpu.memory_space<vmem>>, vector<1x64xf32>
    %36 = vector.broadcast %35 : vector<1x64xf32> to vector<8x64xf32>
    %37 = arith.mulf %34, %36 : vector<8x64xf32>
    %c0_14 = arith.constant 0 : index
    %c0_15 = arith.constant 0 : index
    %38 = vector.load %arg5[%c0_14, %c0_15] : memref<1x64xf32, #tpu.memory_space<vmem>>, vector<1x64xf32>
    %39 = vector.broadcast %38 : vector<1x64xf32> to vector<8x64xf32>
    %40 = arith.addf %37, %39 : vector<8x64xf32>
    %c0_16 = arith.constant 0 : index
    %c0_17 = arith.constant 0 : index
    %41 = vector.load %arg6[%c0_16, %c0_17] : memref<64x128xf32, #tpu.memory_space<vmem>>, vector<64x128xf32>
    %cst_18 = arith.constant dense<0.000000e+00> : vector<8x128xf32>
    %42 = tpu.matmul %40, %41, %cst_18 {dimension_numbers = #tpu.dot_dimension_numbers<[1], [0], [0], [1], [0, 0, 1, 1], [], []>} : vector<8x64xf32>, vector<64x128xf32>, vector<8x128xf32> -> vector<8x128xf32>
    %c0_19 = arith.constant 0 : index
    %c0_20 = arith.constant 0 : index
    %43 = vector.load %arg7[%c0_19, %c0_20] : memref<1x128xf32, #tpu.memory_space<vmem>>, vector<1x128xf32>
    %44 = vector.broadcast %43 : vector<1x128xf32> to vector<8x128xf32>
    %45 = arith.addf %42, %44 : vector<8x128xf32>
    %c0_21 = arith.constant 0 : index
    %c0_22 = arith.constant 0 : index
    %46 = vector.load %arg8[%c0_21, %c0_22] : memref<8x128xf32, #tpu.memory_space<vmem>>, vector<8x128xf32>
    tpu.vector_store %arg8[%c0_21, %c0_22], %45 {strides = array<i32>} : memref<8x128xf32, #tpu.memory_space<vmem>>, vector<8x128xf32>,
    return
  }
  func.func @transform_0(%arg0: i32) -> (i32, i32) {
    %c0_i32 = arith.constant 0 : i32
    %c0_i32_0 = arith.constant 0 : i32
    return %arg0, %c0_i32 : i32, i32
  }
  func.func @transform_1(%arg0: i32) -> (i32, i32) {
    %c0_i32 = arith.constant 0 : i32
    %c0_i32_0 = arith.constant 0 : i32
    %c0_i32_1 = arith.constant 0 : i32
    return %c0_i32, %c0_i32_0 : i32, i32
  }
  func.func @transform_2(%arg0: i32) -> (i32, i32) {
    %c0_i32 = arith.constant 0 : i32
    %c0_i32_0 = arith.constant 0 : i32
    %c0_i32_1 = arith.constant 0 : i32
    return %c0_i32, %c0_i32_0 : i32, i32
  }
  func.func @transform_3(%arg0: i32) -> (i32, i32) {
    %c0_i32 = arith.constant 0 : i32
    %c0_i32_0 = arith.constant 0 : i32
    %c0_i32_1 = arith.constant 0 : i32
    return %c0_i32, %c0_i32_0 : i32, i32
  }
  func.func @transform_4(%arg0: i32) -> (i32, i32) {
    %c0_i32 = arith.constant 0 : i32
    %c0_i32_0 = arith.constant 0 : i32
    %c0_i32_1 = arith.constant 0 : i32
    return %c0_i32, %c0_i32_0 : i32, i32
  }
  func.func @transform_5(%arg0: i32) -> (i32, i32) {
    %c0_i32 = arith.constant 0 : i32
    %c0_i32_0 = arith.constant 0 : i32
    %c0_i32_1 = arith.constant 0 : i32
    return %c0_i32, %c0_i32_0 : i32, i32
  }
  func.func @transform_6(%arg0: i32) -> (i32, i32) {
    %c0_i32 = arith.constant 0 : i32
    %c0_i32_0 = arith.constant 0 : i32
    %c0_i32_1 = arith.constant 0 : i32
    return %c0_i32, %c0_i32_0 : i32, i32
  }
  func.func @transform_7(%arg0: i32) -> (i32, i32) {
    %c0_i32 = arith.constant 0 : i32
    %c0_i32_0 = arith.constant 0 : i32
    return %arg0, %c0_i32 : i32, i32
  }
}

</mosaic_0001>

<bundles_post_ra>
// kernel: tpu_custom_call.1
= control target key start
LH: loop header
LB: loop body
LE: loop exit
PB: predicated region body
PF: predicated region fallthrough
CT: control target
= control target key end

     0   :  { %12 = vsyncpa [#allocation3], 0  ;;  %s598_s0 = inlined_call_operand.hbm [shape: f32[8,32], index: 0, kind: input, shape index: {}]   ;;  %s599_s1 = inlined_call_operand.hbm [shape: f32[32,64], index: 1, kind: input, shape index: {}]   ;;  %s600_s2 = inlined_call_operand.vmem [shape: f32[1,64], index: 2, kind: input, shape index: {}]   ;;  %s601_s3 = inlined_call_operand.vmem [shape: f32[1,64], index: 3, kind: input, shape index: {}]   ;;  %s602_s4 = inlined_call_operand.vmem [shape: f32[1,64], index: 4, kind: input, shape index: {}]   ;;  %s603_s5 = inlined_call_operand.hbm [shape: f32[64,128], index: 5, kind: input, shape index: {}]   ;;  %s604_s6 = inlined_call_operand.vmem [shape: f32[1,128], index: 6, kind: input, shape index: {}]   ;;  %s605_s7 = inlined_call_operand.hbm [shape: f32[8,128], index: 7, kind: output, shape index: {}]  }
   0x1   :  { %13 = vsyncpa [#allocation6], 0 }
   0x2   :  { %14 = vsyncpa [#allocation4], 0  ;;  %s478_s24 = smov [#allocation5]   ;;  %s384_s28 = scalar_lea.hbm %s599_s1, 512 }
   0x3   :  { %s30_s25 = sshll.u32 %s478_s24, 4  ;;  %p385_p0 = scmp.ne.s32.totalorder %s599_s1, %s384_s28  ;;  %s31_s25 = int_to_ptr.vmem [resolvable:$true] %s30_s25 }
   0x4   :  { %p388_p1 = scmp.lt.u32.totalorder %s384_s28, %s599_s1 }
   0x6   :  { %p390_p2 = pnand %p388_p1, %p385_p0 }
   0x8   :  { %393 = shalt.err (!%p390_p2)
}
   0x9   :  { %s394_s10 = scalar_lea.vmem %s31_s25, 512  ;;  %p399_p4 = scmp.lt.s32.totalorder %s31_s25, %s31_s25 }
   0xa   :  { %p395_p3 = scmp.ne.s32.totalorder %s31_s25, %s394_s10  ;;  %p400_p5 = scmp.lt.s32.totalorder %s394_s10, %s394_s10 }
   0xc   :  { %p401_p6 = por %p400_p5, %p399_p4 }
   0xe   :  { %p402_p7 = pnand %p401_p6, %p395_p3 }
  0x10   :  { %405 = shalt.err (!%p402_p7)
}
  0x11   :  { %s479_s11 = smov 128   ;;  %s480_s12 = smov 8  }
  0x12   :  { %36 = dma.hbm_to_vmem [thread:$0]  %s599_s1, 512, %s31_s25, [#allocation6], %s479_s11, %s479_s11, %s480_s12  }
  0x13   :  { %s481_s15 = smov [#allocation2]   ;;  %s482_s17 = smov [#allocation7]  }
  0x14   :  { %s21_s16 = sshll.u32 %s481_s15, 4  ;;  %s48_s18 = sshll.u32 %s482_s17, 4  ;;  %s22_s16 = int_to_ptr.vmem [resolvable:$true] %s21_s16  ;;  %s49_s18 = int_to_ptr.vmem [resolvable:$true] %s48_s18 }
  0x15   :  { %s406_s21 = scalar_lea.hbm %s598_s0, 128 }
  0x16   :  { %p407_p8 = scmp.ne.s32.totalorder %s598_s0, %s406_s21  ;;  %p410_p9 = scmp.lt.u32.totalorder %s406_s21, %s598_s0 }
  0x18   :  { %p412_p10 = pnand %p410_p9, %p407_p8 }
  0x1a   :  { %415 = shalt.err (!%p412_p10)
}
  0x1b   :  { %s416_s1 = scalar_lea.vmem %s22_s16, 128  ;;  %p421_p12 = scmp.lt.s32.totalorder %s22_s16, %s22_s16 }
  0x1c   :  { %p417_p11 = scmp.ne.s32.totalorder %s22_s16, %s416_s1  ;;  %p422_p13 = scmp.lt.s32.totalorder %s416_s1, %s416_s1 }
  0x1e   :  { %p423_p0 = por %p422_p13, %p421_p12 }
  0x20   :  { %p424_p1 = pnand %p423_p0, %p417_p11 }
  0x22   :  { %427 = shalt.err (!%p424_p1)
}
  0x23   :  { %24 = dma.hbm_to_vmem [thread:$0]  %s598_s0, 128, %s22_s16, [#allocation3]  }
  0x24   :  { %s428_s30 = scalar_lea.hbm %s603_s5, 1024 }
  0x25   :  { %p429_p2 = scmp.ne.s32.totalorder %s603_s5, %s428_s30  ;;  %p432_p3 = scmp.lt.u32.totalorder %s428_s30, %s603_s5 }
  0x27   :  { %p434_p4 = pnand %p432_p3, %p429_p2 }
  0x29   :  { %437 = shalt.err (!%p434_p4)
}
  0x2a   :  { %s438_s14 = scalar_lea.vmem %s49_s18, 1024  ;;  %p443_p6 = scmp.lt.s32.totalorder %s49_s18, %s49_s18 }
  0x2b   :  { %p439_p5 = scmp.ne.s32.totalorder %s49_s18, %s438_s14  ;;  %p444_p7 = scmp.lt.s32.totalorder %s438_s14, %s438_s14 }
  0x2d   :  { %p445_p8 = por %p444_p7, %p443_p6 }
  0x2f   :  { %p446_p9 = pnand %p445_p8, %p439_p5 }
  0x31   :  { %449 = shalt.err (!%p446_p9)
}
  0x32   :  { %54 = dma.hbm_to_vmem [thread:$0]  %s603_s5, 1024, %s49_s18, [#allocation6], %s479_s11, %s479_s11, %s480_s12  }
  0x33   :  { %472 = dma.done.wait [#allocation3], 128  }
  0x34   :  { %473 = vsyncadd [#allocation3], 4294967168 }
  0x35   :  { %474 = dma.done.wait [#allocation6], 1536  }
  0x36   :  { %475 = vsyncadd [#allocation6], 4294965760  ;;  %v483_v0 = vmov 0.0|0.0   ;;  %vm484_vm0 = vmmov 0   ;;  %v485_v1 = vmov 0.0   ;;  %v67_v2 = vld [vmem:[#allocation5] sm:$0xff] }
  0x37   :  { %351 = vmatprep.subr.bf16.mxu0 %v483_v0  ;;  %329 = vmatprep.mubr.msk.f32.mxu0 %vm484_vm0, %v485_v1  ;;  %v68_v3 = vld [vmem:[#allocation5 + $0x8] sm:$0xff]  ;;  %v69_v4 = vld [vmem:[#allocation5 + $0x10] sm:$0xff]  ;;  %v70_v6 = vld [vmem:[#allocation5 + $0x18] sm:$0xff]  ;;  %vm78_vm1 = vcmask 261120   ;;  %vm152_vm2 = vcmask 523264   ;;  %s486_s20 = smov [#allocation8]  }
  0x38   :  { %357 = vmatprep.subr.bf16.mxu1 %v483_v0  ;;  %348 = vmatprep.mubr.msk.f32.mxu1 %vm484_vm0, %v485_v1  ;;  %v352_v5 = vpack.c.bf16 %v68_v3, %v67_v2  ;;  %v355_v7 = vpack.c.bf16 %v70_v6, %v69_v4  ;;  %v66_v8 = vld [vmem:[#allocation2] sm:$0xff]  ;;  %v196_v26 = vld [vmem:[#allocation7] sm:$0xff]  ;;  %v197_v27 = vld [vmem:[#allocation7 + $0x8] sm:$0xff]  ;;  %s291_s21 = sshll.u32 %s486_s20, 4  ;;  %s292_s21 = int_to_ptr.vmem [resolvable:$true] %s291_s21 }
  0x39   :  { %v301_v9 = vld [vmem:[%s600_s2] ss:$0 sm:$0xff]  ;;  %v358_v28 = vpack.c.bf16 %v197_v27, %v196_v26  ;;  %v198_v29 = vld [vmem:[#allocation7 + $0x10] sm:$0xff]  ;;  %v200_v32 = vld [vmem:[#allocation7 + $0x20] sm:$0xff]  ;;  %p455_p11 = scmp.lt.s32.totalorder %s292_s21, %s292_s21 }
  0x3a   :  { %353 = vmatpush3.bf16.msra.mxu0 %v352_v5  ;;  %v199_v30 = vld [vmem:[#allocation7 + $0x18] sm:$0xff]  ;;  %v201_v33 = vld [vmem:[#allocation7 + $0x28] sm:$0xff]  ;;  %v202_v35 = vld [vmem:[#allocation7 + $0x30] sm:$0xff] }
  0x3b   :  { %354 = vmatprep.subr.bf16.mxu0 %v483_v0  ;;  %359 = vmatpush3.bf16.msra.mxu1 %v358_v28  ;;  %v361_v31 = vpack.c.bf16 %v199_v30, %v198_v29  ;;  %v364_v34 = vpack.c.bf16 %v201_v33, %v200_v32  ;;  %v203_v36 = vld [vmem:[#allocation7 + $0x38] sm:$0xff] }
  0x3c   :  { %360 = vmatprep.subr.bf16.mxu1 %v483_v0  ;;  %v367_v37 = vpack.c.bf16 %v203_v36, %v202_v35  ;;  %v303_v47 = vld [vmem:[%s601_s3] ss:$0 sm:$0xff]  ;;  %s450_s3 = scalar_lea.vmem %s292_s21, 128 }
  0x3d   :  { %v304_v49 = vld [vmem:[%s602_s4] ss:$0 sm:$0xff]  ;;  %p451_p10 = scmp.ne.s32.totalorder %s292_s21, %s450_s3  ;;  %p456_p12 = scmp.lt.s32.totalorder %s450_s3, %s450_s3 }
  0x3e   :  { %356 = vmatpush3.bf16.msra.mxu0 %v355_v7  ;;  %v305_v52 = vld [vmem:[%s604_s6] ss:$0 sm:$0xff] }
  0x3f   :  { %362 = vmatpush3.bf16.msra.mxu1 %v361_v31  ;;  %p457_p13 = por %p456_p12, %p455_p11 }
  0x40   :  { %363 = vmatprep.subr.bf16.mxu1 %v483_v0 }
  0x41   :  { %330 = vmatmul.mubr.msk.f32.vlgmr.msra.gmra.mrb[0].mxu0 %vm78_vm1, %v66_v8  ;;  %p458_p0 = pnand %p457_p13, %p451_p10 }
  0x43   :  { %365 = vmatpush3.bf16.msra.mxu1 %v364_v34 }
  0x44   :  { %366 = vmatprep.subr.bf16.mxu1 %v483_v0 }
  0x47   :  { %368 = vmatpush3.bf16.msra.mxu1 %v367_v37 }
 0x114   :  { %v148_v10 = vpop.f32.mrb[0].mxu0 }
 0x115   :  { %v149_v11 = vadd.f32 %v301_v9, %v148_v10  ;;  %v331_v12 = vpop.f32.mrb[1].mxu0 }
 0x117   :  { %v153_v13 = vsel %vm152_vm2, %v149_v11, -inf }
 0x118   :  { %154 = vmax.xlane.f32.xlu0 %v153_v13 }
 0x1a5   :  { %v155_v14 = vpop.xlane.xlu0 %154 }
 0x1a6   :  { %v156_v15 = vsub.f32 %v149_v11, %v155_v14 }
 0x1a8   :  { %v157_v16 = vmul.f32 1.442695, %v156_v15 }
 0x1aa   :  { %378 = vpow2.f32 %v157_v16 }
 0x1b4   :  { %v379_v17 = vpop.eup %378 }
 0x1b5   :  { %v159_v18 = vsel %vm152_vm2, %v379_v17, 0.0 }
 0x1b6   :  { %160 = vadd.xlane.f32.xlu0 %v159_v18 }
 0x243   :  { %v161_v19 = vpop.xlane.xlu0 %160 }
 0x244   :  { %380 = vrcp.f32 %v161_v19 }
 0x24e   :  { %v381_v20 = vpop.eup %380 }
 0x24f   :  { %v163_v21 = vmul.f32 %v381_v20, %v379_v17 }
 0x251   :  { %v164_v22 = vmul.f32 %v163_v21, %v149_v11 }
 0x253   :  { %v165_v23 = vsel %vm152_vm2, %v164_v22, 0.0  ;;  %v168_v24 = vmul.f32 %v164_v22, %v164_v22 }
 0x254   :  { %166 = vadd.xlane.f32.xlu1 %v165_v23 }
 0x255   :  { %v169_v25 = vsel %vm152_vm2, %v168_v24, 0.0 }
 0x258   :  { %170 = vadd.xlane.f32.xlu1 %v169_v25 }
 0x2e1   :  { %v167_v38 = vpop.xlane.xlu1 %166 }
 0x2e2   :  { %v172_v39 = vmul.f32 0.015625, %v167_v38 }
 0x2e4   :  { %v174_v41 = vmul.f32 %v172_v39, %v172_v39  ;;  %v176_v45 = vsub.f32 %v164_v22, %v172_v39 }
 0x2e5   :  { %v171_v40 = vpop.xlane.xlu1 %170 }
 0x2e6   :  { %v173_v42 = vmul.f32 0.015625, %v171_v40 }
 0x2e8   :  { %v175_v43 = vsub.f32 %v173_v42, %v174_v41 }
 0x2ea   :  { %v177_v44 = vadd.f32 1e-05, %v175_v43 }
 0x2ec   :  { %382 = vrsqrt.f32 %v177_v44 }
 0x2f6   :  { %v383_v46 = vpop.eup %382 }
 0x2f7   :  { %v179_v48 = vmul.f32 %v383_v46, %v176_v45 }
 0x2f9   :  { %v187_v50 = vmul.f32 %v303_v47, %v179_v48 }
 0x2fb   :  { %v195_v51 = vadd.f32 %v304_v49, %v187_v50 }
 0x2fd   :  { %349 = vmatmul.mubr.msk.f32.vlgmr.msra.gmra.mrb[0].mxu1 %vm152_vm2, %v195_v51 }
 0x3d0   :  { %v280_v53 = vpop.f32.mrb[0].mxu1 }
 0x3d1   :  { %v281_v54 = vadd.f32 %v305_v52, %v280_v53  ;;  %v350_v55 = vpop.f32.mrb[1].mxu1 }
 0x3d3   :  { %284 = vst [vmem:[#allocation8] sm:$0xff] %v281_v54 }
 0x3d4   :  { %461 = shalt.err (!%p458_p0)
}
 0x3d5   :  { %s462_s23 = scalar_lea.hbm %s605_s7, 128 }
 0x3d6   :  { %p463_p1 = scmp.ne.s32.totalorder %s605_s7, %s462_s23  ;;  %p466_p2 = scmp.lt.u32.totalorder %s462_s23, %s605_s7 }
 0x3d8   :  { %p468_p3 = pnand %p466_p2, %p463_p1 }
 0x3da   :  { %471 = shalt.err (!%p468_p3)
}
 0x3db   :  { %294 = dma.vmem_to_hbm [thread:$0]  %s292_s21, 128, %s605_s7, [#allocation4]  }
 0x3dc   :  { %476 = dma.done.wait [#allocation4], 128  }
 0x3dd   :  { %477 = vsyncadd [#allocation4], 4294967168 }
 0x3de   :  { %298 = vsyncpa [#allocation3], 1 }
 0x3df   :  { %299 = vsyncpa [#allocation6], 1 }
 0x3e0   :  { %300 = vsyncpa [#allocation4], 1 }

</bundles_post_ra>
